<compile_context>
chip_gen: v7x
topology: tpu7x:2x2x1
jax: 0.10.0
libtpu: 0.0.40
codegen_flags: <defaults>
</compile_context>

<pallas_src>
import functools

import jax
import jax.numpy as jnp
from jax import lax
from jax.experimental import pallas as pl
from jax.experimental.pallas import tpu as pltpu


def _block_kernel(x_ref, w_ref, b_ref, gamma_ref, beta_ref, gmat_ref, ssum_ref,
                  o_ref, *, n_channels, inv_count, eps):
    """One grid step = B_TILE stacked samples.

    x_ref    : (R, K*Cin)    bf16 im2col slab (R = Bt * Tp rows)
    w_ref    : (K*Cin, C)    bf16 conv weight (C = padded out channels)
    b_ref    : (1, C)        f32 conv bias
    gamma_ref: (1, C)        f32 GN scale
    beta_ref : (1, C)        f32 GN shift
    gmat_ref : (C, G)        bf16 one-hot channel -> group (padded ch -> none)
    ssum_ref : (Bt, R)       bf16 row -> sample selector; masks invalid rows
    o_ref    : (R, C)        bf16 output rows
    """
    C = n_channels
    f32 = jnp.float32
    bf16 = jnp.bfloat16
    nt = (((1,), (1,)), ((), ()))   # contract last dims:  A @ B^T
    tn = (((0,), (0,)), ((), ()))   # contract first dims: A^T @ B

    # ---- Conv1d: single im2col matmul (bf16 operands, f32 accumulation) ----
    y = jnp.dot(x_ref[...], w_ref[...], preferred_element_type=f32)       # (R, C)
    y = y + b_ref[...]

    ssum = ssum_ref[...]            # (Bt, R)
    gmat = gmat_ref[...]            # (C, G)

    # ---- GroupNorm, one-pass stats ----
    # One row-dim matmul gives per-sample per-channel sums of y and y^2.
    yy = jnp.concatenate([y, y * y], axis=-1).astype(bf16)                # (R, 2C)
    sums = jnp.dot(ssum, yy, preferred_element_type=f32)                  # (Bt, 2C)
    s1 = sums[:, :C]                                                      # sum y
    s2 = sums[:, C:]                                                      # sum y^2

    mean_g = jnp.dot(s1.astype(bf16), gmat, preferred_element_type=f32) * inv_count  # (Bt, G)
    ey2_g = jnp.dot(s2.astype(bf16), gmat, preferred_element_type=f32) * inv_count   # (Bt, G)
    var_g = jnp.maximum(ey2_g - mean_g * mean_g, 0.0)
    inv_g = lax.rsqrt(var_g + eps)

    # Expand group stats back to channels (one-hot transpose), fold gamma.
    mean_c = lax.dot_general(mean_g.astype(bf16), gmat, nt,
                             preferred_element_type=f32)                  # (Bt, C)
    inv_c = lax.dot_general(inv_g.astype(bf16), gmat, nt,
                            preferred_element_type=f32)                   # (Bt, C)
    a_c = inv_c * gamma_ref[...]                                          # (Bt, C)

    # One row-dim matmul broadcasts [mean, invstd*gamma] back to every row.
    bsrc = jnp.concatenate([mean_c, a_c], axis=-1).astype(bf16)           # (Bt, 2C)
    bcast = lax.dot_general(ssum, bsrc, tn, preferred_element_type=f32)   # (R, 2C)
    mean_r = bcast[:, :C]
    a_r = bcast[:, C:]

    # Folded affine: z = (y - mean) * (invstd * gamma) + beta
    z = (y - mean_r) * a_r + beta_ref[...]

    # ---- Mish: z * tanh(softplus(z)) == z * ((1+e^z)^2 - 1) / ((1+e^z)^2 + 1)
    ez = jnp.exp(jnp.minimum(z, 20.0))      # clamp: for z > 20, mish(z) ~= z
    w1 = 1.0 + ez
    t = w1 * w1
    mish = z * (t - 1.0) * pl.reciprocal(t + 1.0, approx=True)
    o_ref[...] = mish.astype(o_ref.dtype)


def diffusion_conv1d_block(x_ncl, conv_w, conv_b, gn_gamma, gn_beta,
                           *, kernel_size, n_groups, eps=1e-5, batch_tile=32):
    """Pallas implementation of Conv1d(padding=K//2) -> GroupNorm -> Mish.

    x_ncl : (B, C_in, T)   -- PyTorch NCL layout
    conv_w: (C_out, C_in, K)
    conv_b, gn_gamma, gn_beta: (C_out,)
    returns (B, C_out, T), float32
    """
    B, Cin, T = x_ncl.shape
    Cout = conv_w.shape[0]
    K = kernel_size
    assert K % 2 == 1, "kernel_size must be odd (module uses padding=K//2)"
    assert Cout % n_groups == 0
    pad = K // 2
    Tp = T + 2 * pad
    G = n_groups
    gs = Cout // G

    # Batch tiling: stack Bt samples per grid step (amortize ~0.35us/step).
    Bt = min(batch_tile, B)
    if B > Bt:
        # keep the per-block row count sublane-aligned when there are >1 blocks
        while (Bt * Tp) % 8 != 0:
            Bt += 1
    NB = -(-B // Bt)
    B_pad = NB * Bt

    C = ((Cout + 127) // 128) * 128        # lane-dense padded out channels
    Mrows = Bt * Tp                        # output rows per block
    KC = K * Cin                           # im2col contraction depth

    # --- x relayout: NCL -> padded row-major -> bf16 im2col slab -------------
    x_btc = jnp.transpose(x_ncl, (0, 2, 1))                                # (B, T, Cin)
    x_btc = jnp.pad(x_btc, ((0, B_pad - B), (pad, pad), (0, 0)))           # (B_pad, Tp, Cin)
    x_blk = x_btc.reshape(NB, Mrows, Cin)
    x_blk = jnp.pad(x_blk, ((0, 0), (0, K - 1), (0, 0)))                   # (NB, Mrows+K-1, Cin)
    x_im2 = jnp.concatenate([x_blk[:, k:k + Mrows, :] for k in range(K)],
                            axis=-1).astype(jnp.bfloat16)                  # (NB, Mrows, K*Cin)
    x2 = x_im2.reshape(NB * Mrows, KC)

    # --- parameters: relayout, pad channels to C, bf16 conv weights ----------
    w2 = jnp.transpose(conv_w, (2, 1, 0)).reshape(KC, Cout)                # row = k*Cin + cin
    w2 = jnp.pad(w2, ((0, 0), (0, C - Cout))).astype(jnp.bfloat16)         # (KC, C)
    b = jnp.pad(conv_b.astype(jnp.float32), (0, C - Cout)).reshape(1, C)
    gamma = jnp.pad(gn_gamma.astype(jnp.float32), (0, C - Cout)).reshape(1, C)
    beta = jnp.pad(gn_beta.astype(jnp.float32), (0, C - Cout)).reshape(1, C)

    # One-hot channel -> group (padded channels map to no group; exact in bf16).
    gmat = (jnp.arange(C)[:, None] // gs ==
            jnp.arange(G)[None, :]).astype(jnp.bfloat16)                   # (C, G)

    # Row -> sample selector; also masks conv rows that fall in the padding.
    r = jnp.arange(Mrows)
    j = jnp.arange(Bt)
    ssum = ((r[None, :] // Tp == j[:, None]) &
            ((r[None, :] % Tp) < T)).astype(jnp.bfloat16)                  # (Bt, Mrows)

    # VMEM budget: double-buffered x/out blocks + resident params + f32 temps,
    # clamped at 40 MiB so it stays safe on v7x's 64 MiB/TC.
    block_bytes = (2 * Mrows * KC * 2 + 2 * Mrows * C * 2 + KC * C * 2 +
                   3 * C * 4 + C * G * 2 + Bt * Mrows * 2 + 8 * Mrows * C * 4)
    vmem_limit = int(min(40 * 1024 * 1024,
                         max(16 * 1024 * 1024, 2 * block_bytes)))

    kernel = functools.partial(_block_kernel, n_channels=C,
                               inv_count=float(1.0 / (T * gs)), eps=float(eps))

    out2 = pl.pallas_call(
        kernel,
        out_shape=jax.ShapeDtypeStruct((NB * Mrows, C), jnp.bfloat16),
        grid_spec=pltpu.PrefetchScalarGridSpec(
            num_scalar_prefetch=0,
            grid=(NB,),
            in_specs=[
                pl.BlockSpec((Mrows, KC), lambda i: (i, 0)),
                pl.BlockSpec((KC, C), lambda i: (0, 0)),
                pl.BlockSpec((1, C), lambda i: (0, 0)),
                pl.BlockSpec((1, C), lambda i: (0, 0)),
                pl.BlockSpec((1, C), lambda i: (0, 0)),
                pl.BlockSpec((C, G), lambda i: (0, 0)),
                pl.BlockSpec((Bt, Mrows), lambda i: (0, 0)),
            ],
            out_specs=pl.BlockSpec((Mrows, C), lambda i: (i, 0)),
        ),
        compiler_params=pltpu.CompilerParams(
            dimension_semantics=("parallel",),
            vmem_limit_bytes=vmem_limit,
        ),
    )(x2, w2, b, gamma, beta, gmat, ssum)

    # Post-kernel slicing / transpose run on bf16; cast to f32 at the very end.
    out = out2.reshape(NB, Bt, Tp, C)[:, :, :T, :Cout]
    out = out.reshape(B_pad, T, Cout)[:B]
    return jnp.transpose(out, (0, 2, 1)).astype(jnp.float32)   # (B, C_out, T)


def _reference(x_ncl, conv_w, conv_b, gn_gamma, gn_beta,
               *, kernel_size, n_groups, eps=1e-5):
    """Pure-JAX reference (mirrors the PyTorch module; bf16 conv operands to
    match the kernel's MXU precision)."""
    pad = kernel_size // 2
    y = lax.conv_general_dilated(
        x_ncl.astype(jnp.bfloat16), conv_w.astype(jnp.bfloat16),
        window_strides=(1,), padding=[(pad, pad)],
        dimension_numbers=("NCH", "OIH", "NCH"),
        preferred_element_type=jnp.float32)
    y = y + conv_b[None, :, None]
    B, Cch, T = y.shape
    yg = y.reshape(B, n_groups, (Cch // n_groups) * T)
    mean = yg.mean(axis=-1, keepdims=True)
    var = yg.var(axis=-1, keepdims=True)
    yn = ((yg - mean) / jnp.sqrt(var + eps)).reshape(B, Cch, T)
    z = yn * gn_gamma[None, :, None] + gn_beta[None, :, None]
    return z * jnp.tanh(jax.nn.softplus(z))


if __name__ == "__main__":
    # Small shapes consistent with the module's forward.
    B, Cin, Cout, T, K, G = 2, 4, 16, 16, 3, 8

    key = jax.random.PRNGKey(0)
    k1, k2, k3, k4, k5 = jax.random.split(key, 5)
    x = jax.random.normal(k1, (B, Cin, T), dtype=jnp.float32)
    conv_w = 0.3 * jax.random.normal(k2, (Cout, Cin, K), dtype=jnp.float32)
    conv_b = 0.1 * jax.random.normal(k3, (Cout,), dtype=jnp.float32)
    gn_gamma = 1.0 + 0.05 * jax.random.normal(k4, (Cout,), dtype=jnp.float32)
    gn_beta = 0.05 * jax.random.normal(k5, (Cout,), dtype=jnp.float32)

    out = diffusion_conv1d_block(x, conv_w, conv_b, gn_gamma, gn_beta,
                                 kernel_size=K, n_groups=G)
    out = jax.block_until_ready(out)

    ref = _reference(x, conv_w, conv_b, gn_gamma, gn_beta,
                     kernel_size=K, n_groups=G)
    assert out.shape == (B, Cout, T)
    # bf16 MXU operands (conv + GN stat matmuls), bf16 output store and the
    # approximate reciprocal in the Mish epilogue -> loose tolerance.
    assert jnp.allclose(out, ref, atol=2e-2, rtol=2e-2), "mismatch vs reference"

    print("KERNEL_OK")
</pallas_src>

<mosaic_0001>
module attributes {stable_mosaic.version = 11 : i64} {
  func.func @_block_kernel(%arg0: i32, %arg1: memref<36x12xbf16, #tpu.memory_space<vmem>>, %arg2: memref<12x128xbf16, #tpu.memory_space<vmem>>, %arg3: memref<1x128xf32, #tpu.memory_space<vmem>>, %arg4: memref<1x128xf32, #tpu.memory_space<vmem>>, %arg5: memref<1x128xf32, #tpu.memory_space<vmem>>, %arg6: memref<128x8xbf16, #tpu.memory_space<vmem>>, %arg7: memref<2x36xbf16, #tpu.memory_space<vmem>>, %arg8: memref<36x128xbf16, #tpu.memory_space<vmem>>) attributes {dimension_semantics = [#tpu.dimension_semantics<parallel>], iteration_bounds = array<i64: 1>, scalar_prefetch = 0 : i64, scratch_operands = 0 : i64, tpu.core_type = #tpu.core_type<tc>, window_params = [{transform_indices = @transform_0, window_bounds = array<i64: 36, 12>}, {pipeline_mode = #tpu.pipeline_mode<synchronous>, transform_indices = @transform_1, window_bounds = array<i64: 12, 128>}, {pipeline_mode = #tpu.pipeline_mode<synchronous>, transform_indices = @transform_2, window_bounds = array<i64: 1, 128>}, {pipeline_mode = #tpu.pipeline_mode<synchronous>, transform_indices = @transform_3, window_bounds = array<i64: 1, 128>}, {pipeline_mode = #tpu.pipeline_mode<synchronous>, transform_indices = @transform_4, window_bounds = array<i64: 1, 128>}, {pipeline_mode = #tpu.pipeline_mode<synchronous>, transform_indices = @transform_5, window_bounds = array<i64: 128, 8>}, {pipeline_mode = #tpu.pipeline_mode<synchronous>, transform_indices = @transform_6, window_bounds = array<i64: 2, 36>}, {transform_indices = @transform_7, window_bounds = array<i64: 36, 128>}]} {
    %c0 = arith.constant 0 : index
    %c0_0 = arith.constant 0 : index
    %0 = vector.load %arg1[%c0, %c0_0] : memref<36x12xbf16, #tpu.memory_space<vmem>>, vector<36x12xbf16>
    %c0_1 = arith.constant 0 : index
    %c0_2 = arith.constant 0 : index
    %1 = vector.load %arg2[%c0_1, %c0_2] : memref<12x128xbf16, #tpu.memory_space<vmem>>, vector<12x128xbf16>
    %cst = arith.constant dense<0.000000e+00> : vector<36x128xf32>
    %2 = tpu.matmul %0, %1, %cst {dimension_numbers = #tpu.dot_dimension_numbers<[1], [0], [0], [1], [0, 0, 1, 1], [], []>} : vector<36x12xbf16>, vector<12x128xbf16>, vector<36x128xf32> -> vector<36x128xf32>
    %c0_3 = arith.constant 0 : index
    %c0_4 = arith.constant 0 : index
    %3 = vector.load %arg3[%c0_3, %c0_4] : memref<1x128xf32, #tpu.memory_space<vmem>>, vector<1x128xf32>
    %4 = vector.broadcast %3 : vector<1x128xf32> to vector<36x128xf32>
    %5 = arith.addf %2, %4 : vector<36x128xf32>
    %c0_5 = arith.constant 0 : index
    %c0_6 = arith.constant 0 : index
    %6 = vector.load %arg7[%c0_5, %c0_6] : memref<2x36xbf16, #tpu.memory_space<vmem>>, vector<2x36xbf16>
    %c0_7 = arith.constant 0 : index
    %c0_8 = arith.constant 0 : index
    %7 = vector.load %arg6[%c0_7, %c0_8] : memref<128x8xbf16, #tpu.memory_space<vmem>>, vector<128x8xbf16>
    %8 = arith.mulf %5, %5 : vector<36x128xf32>
    %9 = tpu.concatenate %5, %8 in 1 : vector<36x128xf32>, vector<36x128xf32> -> vector<36x256xf32>
    %10 = arith.truncf %9 : vector<36x256xf32> to vector<36x256xbf16>
    %cst_9 = arith.constant dense<0.000000e+00> : vector<2x256xf32>
    %11 = tpu.matmul %6, %10, %cst_9 {dimension_numbers = #tpu.dot_dimension_numbers<[1], [0], [0], [1], [0, 0, 1, 1], [], []>} : vector<2x36xbf16>, vector<36x256xbf16>, vector<2x256xf32> -> vector<2x256xf32>
    %12 = vector.extract_strided_slice %11 {offsets = [0, 0], sizes = [2, 128], strides = [1, 1]} : vector<2x256xf32> to vector<2x128xf32>
    %13 = vector.extract_strided_slice %11 {offsets = [0, 128], sizes = [2, 128], strides = [1, 1]} : vector<2x256xf32> to vector<2x128xf32>
    %14 = arith.truncf %12 : vector<2x128xf32> to vector<2x128xbf16>
    %cst_10 = arith.constant dense<0.000000e+00> : vector<2x8xf32>
    %15 = tpu.matmul %14, %7, %cst_10 {dimension_numbers = #tpu.dot_dimension_numbers<[1], [0], [0], [1], [0, 0, 1, 1], [], []>} : vector<2x128xbf16>, vector<128x8xbf16>, vector<2x8xf32> -> vector<2x8xf32>
    %cst_11 = arith.constant 3.125000e-02 : f32
    %16 = vector.broadcast %cst_11 : f32 to vector<2x8xf32>
    %17 = arith.mulf %15, %16 : vector<2x8xf32>
    %18 = arith.truncf %13 : vector<2x128xf32> to vector<2x128xbf16>
    %cst_12 = arith.constant dense<0.000000e+00> : vector<2x8xf32>
    %19 = tpu.matmul %18, %7, %cst_12 {dimension_numbers = #tpu.dot_dimension_numbers<[1], [0], [0], [1], [0, 0, 1, 1], [], []>} : vector<2x128xbf16>, vector<128x8xbf16>, vector<2x8xf32> -> vector<2x8xf32>
    %cst_13 = arith.constant 3.125000e-02 : f32
    %20 = vector.broadcast %cst_13 : f32 to vector<2x8xf32>
    %21 = arith.mulf %19, %20 : vector<2x8xf32>
    %22 = arith.mulf %17, %17 : vector<2x8xf32>
    %23 = arith.subf %21, %22 : vector<2x8xf32>
    %cst_14 = arith.constant 0.000000e+00 : f32
    %24 = vector.broadcast %cst_14 : f32 to vector<2x8xf32>
    %25 = arith.maximumf %23, %24 : vector<2x8xf32>
    %cst_15 = arith.constant 9.99999974E-6 : f32
    %26 = vector.broadcast %cst_15 : f32 to vector<2x8xf32>
    %27 = arith.addf %25, %26 : vector<2x8xf32>
    %28 = math.rsqrt %27 : vector<2x8xf32>
    %29 = arith.truncf %17 : vector<2x8xf32> to vector<2x8xbf16>
    %cst_16 = arith.constant dense<0.000000e+00> : vector<2x128xf32>
    %30 = tpu.matmul %29, %7, %cst_16 {dimension_numbers = #tpu.dot_dimension_numbers<[1], [1], [0], [0], [0, 0, 1, 0], [], []>} : vector<2x8xbf16>, vector<128x8xbf16>, vector<2x128xf32> -> vector<2x128xf32>
    %31 = arith.truncf %28 : vector<2x8xf32> to vector<2x8xbf16>
    %cst_17 = arith.constant dense<0.000000e+00> : vector<2x128xf32>
    %32 = tpu.matmul %31, %7, %cst_17 {dimension_numbers = #tpu.dot_dimension_numbers<[1], [1], [0], [0], [0, 0, 1, 0], [], []>} : vector<2x8xbf16>, vector<128x8xbf16>, vector<2x128xf32> -> vector<2x128xf32>
    %c0_18 = arith.constant 0 : index
    %c0_19 = arith.constant 0 : index
    %33 = vector.load %arg4[%c0_18, %c0_19] : memref<1x128xf32, #tpu.memory_space<vmem>>, vector<1x128xf32>
    %34 = vector.broadcast %33 : vector<1x128xf32> to vector<2x128xf32>
    %35 = arith.mulf %32, %34 : vector<2x128xf32>
    %36 = tpu.concatenate %30, %35 in 1 : vector<2x128xf32>, vector<2x128xf32> -> vector<2x256xf32>
    %37 = arith.truncf %36 : vector<2x256xf32> to vector<2x256xbf16>
    %cst_20 = arith.constant dense<0.000000e+00> : vector<36x256xf32>
    %38 = tpu.matmul %6, %37, %cst_20 {dimension_numbers = #tpu.dot_dimension_numbers<[0], [0], [1], [1], [0, 1, 1, 1], [], []>} : vector<2x36xbf16>, vector<2x256xbf16>, vector<36x256xf32> -> vector<36x256xf32>
    %39 = vector.extract_strided_slice %38 {offsets = [0, 0], sizes = [36, 128], strides = [1, 1]} : vector<36x256xf32> to vector<36x128xf32>
    %40 = vector.extract_strided_slice %38 {offsets = [0, 128], sizes = [36, 128], strides = [1, 1]} : vector<36x256xf32> to vector<36x128xf32>
    %41 = arith.subf %5, %39 : vector<36x128xf32>
    %42 = arith.mulf %41, %40 : vector<36x128xf32>
    %c0_21 = arith.constant 0 : index
    %c0_22 = arith.constant 0 : index
    %43 = vector.load %arg5[%c0_21, %c0_22] : memref<1x128xf32, #tpu.memory_space<vmem>>, vector<1x128xf32>
    %44 = vector.broadcast %43 : vector<1x128xf32> to vector<36x128xf32>
    %45 = arith.addf %42, %44 : vector<36x128xf32>
    %cst_23 = arith.constant 2.000000e+01 : f32
    %46 = vector.broadcast %cst_23 : f32 to vector<36x128xf32>
    %47 = arith.minimumf %45, %46 : vector<36x128xf32>
    %48 = math.exp %47 : vector<36x128xf32>
    %cst_24 = arith.constant 1.000000e+00 : f32
    %49 = vector.broadcast %cst_24 : f32 to vector<36x128xf32>
    %50 = arith.addf %49, %48 : vector<36x128xf32>
    %51 = arith.mulf %50, %50 : vector<36x128xf32>
    %cst_25 = arith.constant 1.000000e+00 : f32
    %52 = vector.broadcast %cst_25 : f32 to vector<36x128xf32>
    %53 = arith.subf %51, %52 : vector<36x128xf32>
    %54 = arith.mulf %45, %53 : vector<36x128xf32>
    %cst_26 = arith.constant 1.000000e+00 : f32
    %55 = vector.broadcast %cst_26 : f32 to vector<36x128xf32>
    %56 = arith.addf %51, %55 : vector<36x128xf32>
    %57 = tpu.reciprocal %56 {approx = true} : vector<36x128xf32> -> vector<36x128xf32>
    %58 = arith.mulf %54, %57 : vector<36x128xf32>
    %59 = arith.truncf %58 : vector<36x128xf32> to vector<36x128xbf16>
    %c0_27 = arith.constant 0 : index
    %c0_28 = arith.constant 0 : index
    %60 = vector.load %arg8[%c0_27, %c0_28] : memref<36x128xbf16, #tpu.memory_space<vmem>>, vector<36x128xbf16>
    tpu.vector_store %arg8[%c0_27, %c0_28], %59 {strides = array<i32>} : memref<36x128xbf16, #tpu.memory_space<vmem>>, vector<36x128xbf16>,
    return
  }
  func.func @transform_0(%arg0: i32) -> (i32, i32) {
    %c0_i32 = arith.constant 0 : i32
    %c0_i32_0 = arith.constant 0 : i32
    return %arg0, %c0_i32 : i32, i32
  }
  func.func @transform_1(%arg0: i32) -> (i32, i32) {
    %c0_i32 = arith.constant 0 : i32
    %c0_i32_0 = arith.constant 0 : i32
    %c0_i32_1 = arith.constant 0 : i32
    return %c0_i32, %c0_i32_0 : i32, i32
  }
  func.func @transform_2(%arg0: i32) -> (i32, i32) {
    %c0_i32 = arith.constant 0 : i32
    %c0_i32_0 = arith.constant 0 : i32
    %c0_i32_1 = arith.constant 0 : i32
    return %c0_i32, %c0_i32_0 : i32, i32
  }
  func.func @transform_3(%arg0: i32) -> (i32, i32) {
    %c0_i32 = arith.constant 0 : i32
    %c0_i32_0 = arith.constant 0 : i32
    %c0_i32_1 = arith.constant 0 : i32
    return %c0_i32, %c0_i32_0 : i32, i32
  }
  func.func @transform_4(%arg0: i32) -> (i32, i32) {
    %c0_i32 = arith.constant 0 : i32
    %c0_i32_0 = arith.constant 0 : i32
    %c0_i32_1 = arith.constant 0 : i32
    return %c0_i32, %c0_i32_0 : i32, i32
  }
  func.func @transform_5(%arg0: i32) -> (i32, i32) {
    %c0_i32 = arith.constant 0 : i32
    %c0_i32_0 = arith.constant 0 : i32
    %c0_i32_1 = arith.constant 0 : i32
    return %c0_i32, %c0_i32_0 : i32, i32
  }
  func.func @transform_6(%arg0: i32) -> (i32, i32) {
    %c0_i32 = arith.constant 0 : i32
    %c0_i32_0 = arith.constant 0 : i32
    %c0_i32_1 = arith.constant 0 : i32
    return %c0_i32, %c0_i32_0 : i32, i32
  }
  func.func @transform_7(%arg0: i32) -> (i32, i32) {
    %c0_i32 = arith.constant 0 : i32
    %c0_i32_0 = arith.constant 0 : i32
    return %arg0, %c0_i32 : i32, i32
  }
}

</mosaic_0001>

<bundles_post_ra>
// kernel: tpu_custom_call.1
= control target key start
LH: loop header
LB: loop body
LE: loop exit
PB: predicated region body
PF: predicated region fallthrough
CT: control target
= control target key end

     0   :  { %vm70_vm0 = vcmask 1045504   ;;  %v930_v0 = vmov 0.0   ;;  %vm931_vm1 = vmmov 0   ;;  %vm60_vm2 = vcmask 97280   ;;  %s1167_s0 = inlined_call_operand.vmem [shape: bf16[36,12], index: 0, kind: input, shape index: {}]   ;;  %s1168_s1 = inlined_call_operand.vmem [shape: bf16[12,128], index: 1, kind: input, shape index: {}]   ;;  %s1169_s2 = inlined_call_operand.vmem [shape: f32[1,128], index: 2, kind: input, shape index: {}]   ;;  %s1170_s3 = inlined_call_operand.vmem [shape: f32[1,128], index: 3, kind: input, shape index: {}]   ;;  %s1171_s4 = inlined_call_operand.vmem [shape: f32[1,128], index: 4, kind: input, shape index: {}]   ;;  %s1172_s5 = inlined_call_operand.vmem [shape: bf16[128,8], index: 5, kind: input, shape index: {}]   ;;  %s1173_s6 = inlined_call_operand.vmem [shape: bf16[2,36], index: 6, kind: input, shape index: {}]   ;;  %s1174_s7 = inlined_call_operand.hbm [shape: bf16[36,128], index: 7, kind: output, shape index: {}]  }
   0x1   :  { %770 = vmatprep.subr.bf16.mxu0 %v930_v0  ;;  %v872_v1 = vld [vmem:[%s1168_s1] sm:$0x3f]   ;;  %772 = vmatprep.mubr.msk.bf16.mxu0 %vm931_vm1, %v930_v0 }
   0x2   :  { %v72_v2 = vsel %vm70_vm0, %v872_v1, 0  ;;  %v873_v3 = vld [vmem:[%s1167_s0] sm:$0xff]  }
   0x3   :  { %771 = vmatpush3.bf16.msra.mxu0 %v72_v2 }
   0x4   :  { %784 = vmatprep.subr.bf16.mxu0 %v930_v0 }
   0x6   :  { %773 = vmatmul.mubr.msk.bf16.vlgmr.msra.gmra.mrb[0].mxu0 %vm60_vm2, %v873_v3 }
   0x7   :  { %776 = vmatprep.mubr.msk.bf16.mxu0 %vm931_vm1, %v930_v0 }
   0x8   :  { %12 = vsyncpa [#allocation3], 0  ;;  %v874_v4 = vld [vmem:[%s1167_s0 + $0x8] sm:$0xff]   ;;  %v875_v5 = vld [vmem:[%s1167_s0 + $0x10] ss:$0 sps:$4 sm:$0x33]  }
   0x9   :  { %v1001_v6 = vld [vmem:[%s1173_s6] sm:$0x1]  ;;  %v932_v7 = vmov 0   ;;  %v1014_v9 = vld [vmem:[%s1172_s5 + $0x8] sm:$0xff]   ;;  %v1021_v10 = vld [vmem:[%s1172_s5 + $0x10] sm:$0xff]   ;;  %vm162_vm3 = vcmask 1041408  }
   0xa   :  { %201 = vmatprep.mubr.bf16.mxu1 %v932_v7  ;;  %470 = vxpose.xlu0.c.b16.start.end [1/1] (short) (narrow) %v1001_v6, 48  ;;  %v1008_v8 = vld [vmem:[%s1172_s5] sm:$0xff]   ;;  %v1028_v11 = vld [vmem:[%s1172_s5 + $0x18] sm:$0xff]   ;;  %v1042_v13 = vld [vmem:[%s1172_s5 + $0x28] sm:$0xff]   ;;  %vm158_vm4 = vcmask 293888   ;;  %vm348_vm5 = vcmask 64512  }
   0xb   :  { %785 = vmatpush3.bf16.msra.mxu0 %v1008_v8  ;;  %v1035_v12 = vld [vmem:[%s1172_s5 + $0x20] sm:$0xff]   ;;  %v1049_v14 = vld [vmem:[%s1172_s5 + $0x30] sm:$0xff]   ;;  %v883_v45 = vld [vmem:[%s1172_s5 + $0x38] sm:$0xff]   ;;  %v353_v49 = vsel %vm348_vm5, %v1008_v8, 0  ;;  %v356_v53 = vsel %vm348_vm5, %v1014_v9, 0  ;;  %v359_v54 = vsel %vm348_vm5, %v1021_v10, 0 }
   0xc   :  { %786 = vmatprep.subr.bf16.mxu0 %v930_v0  ;;  %v678_v15 = vld [vmem:[%s1169_s2] ss:$0 sm:$0xff]  ;;  %v362_v55 = vsel %vm348_vm5, %v1028_v11, 0  ;;  %v365_v56 = vsel %vm348_vm5, %v1035_v12, 0  ;;  %v368_v57 = vsel %vm348_vm5, %v1042_v13, 0  ;;  %v371_v58 = vsel %vm348_vm5, %v1049_v14, 0 }
   0xd   :  { %v374_v59 = vsel %vm348_vm5, %v883_v45, 0  ;;  %vm496_vm6 = vcmask 1040384   ;;  %vm486_vm7 = vcmask 15360  }
   0xe   :  { %777 = vmatmul.mubr.msk.bf16.gmra.mrb[4].mxu0 %vm60_vm2, %v874_v4 }
   0xf   :  { %780 = vmatprep.mubr.msk.bf16.mxu0 %vm931_vm1, %v930_v0  ;;  %787 = vmatpush3.bf16.msra.mxu0 %v1014_v9 }
  0x10   :  { %788 = vmatprep.subr.bf16.mxu0 %v930_v0 }
  0x13   :  { %789 = vmatpush3.bf16.msra.mxu0 %v1021_v10 }
  0x14   :  { %790 = vmatprep.subr.bf16.mxu0 %v930_v0 }
  0x16   :  { %781 = vmatmul.mubr.msk.bf16.gmra.mrb[8].mxu0 %vm60_vm2, %v875_v5 }
  0x17   :  { %800 = vmatprep.mubr.msk.bf16.mxu0 %vm931_vm1, %v930_v0  ;;  %791 = vmatpush3.bf16.msra.mxu0 %v1028_v11 }
  0x18   :  { %792 = vmatprep.subr.bf16.mxu0 %v930_v0 }
  0x1b   :  { %793 = vmatpush3.bf16.msra.mxu0 %v1035_v12 }
  0x1c   :  { %794 = vmatprep.subr.bf16.mxu0 %v930_v0 }
  0x1f   :  { %795 = vmatpush3.bf16.msra.mxu0 %v1042_v13 }
  0x20   :  { %796 = vmatprep.subr.bf16.mxu0 %v930_v0 }
  0x23   :  { %797 = vmatpush3.bf16.msra.mxu0 %v1049_v14 }
  0x24   :  { %798 = vmatprep.subr.bf16.mxu0 %v930_v0 }
  0x27   :  { %799 = vmatpush3.bf16.msra.mxu0 %v883_v45 }
  0x28   :  { %824 = vmatprep.subr.bf16.mxu0 %v930_v0 }
  0xd9   :  { %v108_v16 = vpop.f32.mrb[0].mxu0 }
  0xda   :  { %v1057_v17 = vadd.f32 %v678_v15, %v108_v16  ;;  %v774_v18 = vpop.f32.mrb[1].mxu0 }
  0xdb   :  { %v111_v19 = vpop.f32.mrb[2].mxu0 }
  0xdc   :  { %v1059_v20 = vadd.f32 %v678_v15, %v111_v19  ;;  %v775_v21 = vpop.f32.mrb[3].mxu0  ;;  %v147_v22 = vmul.f32 %v1057_v17, %v1057_v17  ;;  %v478_v19 = vpop.trf.xlu0 }
  0xdd   :  { %v698_v21 = vld [vmem:[%s1170_s3] ss:$0 sm:$0xff] }
  0xde   :  { %v148_v23 = vmul.f32 %v1059_v20, %v1059_v20  ;;  %v152_v26 = vpack.c.bf16 %v1059_v20, %v1057_v17 }
  0xe0   :  { %v153_v24 = vpack.c.bf16 %v148_v23, %v147_v22  ;;  %v479_v23 = vpop.trf.xlu0 }
  0xe1   :  { %v116_v25 = vpop.f32.mrb[4].mxu0 }
  0xe2   :  { %v1067_v27 = vadd.f32 %v678_v15, %v116_v25  ;;  %v778_v28 = vpop.f32.mrb[5].mxu0  ;;  %169 = vmatprep.subr.bf16.mxu1 %v153_v24 }
  0xe3   :  { %v119_v29 = vpop.f32.mrb[6].mxu0  ;;  %170 = vmatpush1.bf16.msra.mxu1 %v152_v26 }
  0xe4   :  { %v1069_v30 = vadd.f32 %v678_v15, %v119_v29  ;;  %v779_v31 = vpop.f32.mrb[7].mxu0  ;;  %v149_v32 = vmul.f32 %v1067_v27, %v1067_v27 }
  0xe6   :  { %v150_v33 = vmul.f32 %v1069_v30, %v1069_v30  ;;  %v154_v36 = vpack.c.bf16 %v1069_v30, %v1067_v27 }
  0xe8   :  { %v155_v34 = vpack.c.bf16 %v150_v33, %v149_v32  ;;  %v480_v33 = vpop.trf.xlu0 }
  0xe9   :  { %v124_v35 = vpop.f32.mrb[8].mxu0 }
  0xea   :  { %v1077_v37 = vadd.f32 %v678_v15, %v124_v35  ;;  %v782_v38 = vpop.f32.mrb[9].mxu0  ;;  %171 = vmatprep.subr.bf16.mxu1 %v155_v34 }
  0xeb   :  { %v127_v39 = vpop.f32.mrb[10].mxu0  ;;  %172 = vmatpush1.bf16.msra.mxu1 %v154_v36 }
  0xec   :  { %v151_v40 = vmul.f32 %v1077_v37, %v1077_v37  ;;  %v783_v41 = vpop.f32.mrb[11].mxu0  ;;  %v156_v42 = vpack.c.bf16 %v1077_v37, %v1077_v37 }
  0xed   :  { %v703_v41 = vld [vmem:[%s1171_s4] ss:$0 sm:$0xff]  ;;  %s933_s4 = smov [#allocation2]  }
  0xee   :  { %v157_v43 = vpack.c.bf16 %v151_v40, %v151_v40  ;;  %v164_v44 = vsel %vm162_vm3, %v156_v42, 0  ;;  %s667_s27 = sshll.u32 %s933_s4, 4  ;;  %s668_s27 = int_to_ptr.vmem [resolvable:$true] %s667_s27 }
  0xef   :  { %s906_s28 = scalar_lea.vmem %s668_s27, 320  ;;  %p911_p1 = scmp.lt.s32.totalorder %s668_s27, %s668_s27 }
  0xf0   :  { %686 = vmatprep.subr.msk.bf16.mxu1 %vm162_vm3, %v157_v43  ;;  %p907_p0 = scmp.ne.s32.totalorder %s668_s27, %s906_s28  ;;  %p912_p2 = scmp.lt.s32.totalorder %s906_s28, %s906_s28 }
  0xf1   :  { %174 = vmatpush1.bf16.msra.mxu1 %v164_v44 }
  0xf2   :  { %804 = vmatprep.subr.bf16.mxu1 %v930_v0  ;;  %p913_p3 = por %p912_p2, %p911_p1 }
  0xf4   :  { %687 = vmatmul.mubr.msk.bf16.vlgmr.msra.gmra.mrb[0].mxu1 %vm158_vm4, %v1001_v6  ;;  %p914_p4 = pnand %p913_p3, %p907_p0 }
  0xf5   :  { %805 = vmatpush3.bf16.msra.mxu1 %v1008_v8  ;;  %820 = vmatprep.mubr.msk.bf16.mxu1 %vm931_vm1, %v930_v0 }
  0xf6   :  { %806 = vmatprep.subr.bf16.mxu1 %v930_v0 }
  0xf9   :  { %807 = vmatpush3.bf16.msra.mxu1 %v1014_v9 }
  0xfa   :  { %808 = vmatprep.subr.bf16.mxu1 %v930_v0 }
  0xfd   :  { %809 = vmatpush3.bf16.msra.mxu1 %v1021_v10 }
  0xfe   :  { %810 = vmatprep.subr.bf16.mxu1 %v930_v0 }
 0x101   :  { %811 = vmatpush3.bf16.msra.mxu1 %v1028_v11 }
 0x102   :  { %812 = vmatprep.subr.bf16.mxu1 %v930_v0 }
 0x105   :  { %813 = vmatpush3.bf16.msra.mxu1 %v1035_v12 }
 0x106   :  { %814 = vmatprep.subr.bf16.mxu1 %v930_v0 }
 0x109   :  { %815 = vmatpush3.bf16.msra.mxu1 %v1042_v13 }
 0x10a   :  { %816 = vmatprep.subr.bf16.mxu1 %v930_v0 }
 0x10d   :  { %817 = vmatpush3.bf16.msra.mxu1 %v1049_v14 }
 0x10e   :  { %818 = vmatprep.subr.bf16.mxu1 %v930_v0 }
 0x111   :  { %819 = vmatpush3.bf16.msra.mxu1 %v883_v45 }
 0x112   :  { %844 = vmatprep.subr.bf16.mxu1 %v930_v0 }
 0x1c7   :  { %v203_v46 = vpop.f32.mrb[0].mxu1 }
 0x1c8   :  { %v210_v47 = vpack.c.bf16 %v203_v46, %v203_v46  ;;  %v205_v48 = vpop.f32.mrb[1].mxu1 }
 0x1c9   :  { %v300_v50 = vpack.c.bf16 %v205_v48, %v205_v48  ;;  %v207_v51 = vpop.f32.mrb[2].mxu1 }
 0x1ca   :  { %v208_v52 = vpop.f32.mrb[3].mxu1  ;;  %801 = vmatmul.mubr.bf16.vlgmr.msra.gmra.mrb[12].mxu0 %v210_v47 }
 0x1cb   :  { %821 = vmatmul.mubr.bf16.vlgmr.msra.gmra.mrb[4].mxu1 %v300_v50  ;;  %825 = vmatpush3.bf16.xpose.msra.mxu0 %v353_v49 }
 0x1cc   :  { %826 = vmatprep.subr.bf16.mxu0 %v930_v0  ;;  %845 = vmatpush3.bf16.xpose.msra.mxu1 %v353_v49 }
 0x1cd   :  { %846 = vmatprep.subr.bf16.mxu1 %v930_v0  ;;  %840 = vmatprep.mubr.msk.bf16.mxu0 %vm931_vm1, %v930_v0 }
 0x1ce   :  { %860 = vmatprep.mubr.msk.bf16.mxu1 %vm931_vm1, %v930_v0 }
 0x1d3   :  { %827 = vmatpush3.bf16.xpose.msra.mxu0 %v356_v53 }
 0x1d4   :  { %828 = vmatprep.subr.bf16.mxu0 %v930_v0  ;;  %847 = vmatpush3.bf16.xpose.msra.mxu1 %v356_v53 }
 0x1d5   :  { %848 = vmatprep.subr.bf16.mxu1 %v930_v0 }
 0x1db   :  { %829 = vmatpush3.bf16.xpose.msra.mxu0 %v359_v54 }
 0x1dc   :  { %830 = vmatprep.subr.bf16.mxu0 %v930_v0  ;;  %849 = vmatpush3.bf16.xpose.msra.mxu1 %v359_v54 }
 0x1dd   :  { %850 = vmatprep.subr.bf16.mxu1 %v930_v0 }
 0x1e3   :  { %831 = vmatpush3.bf16.xpose.msra.mxu0 %v362_v55 }
 0x1e4   :  { %832 = vmatprep.subr.bf16.mxu0 %v930_v0  ;;  %851 = vmatpush3.bf16.xpose.msra.mxu1 %v362_v55 }
 0x1e5   :  { %852 = vmatprep.subr.bf16.mxu1 %v930_v0 }
 0x1eb   :  { %833 = vmatpush3.bf16.xpose.msra.mxu0 %v365_v56 }
 0x1ec   :  { %834 = vmatprep.subr.bf16.mxu0 %v930_v0  ;;  %853 = vmatpush3.bf16.xpose.msra.mxu1 %v365_v56 }
 0x1ed   :  { %854 = vmatprep.subr.bf16.mxu1 %v930_v0 }
 0x1f3   :  { %835 = vmatpush3.bf16.xpose.msra.mxu0 %v368_v57 }
 0x1f4   :  { %836 = vmatprep.subr.bf16.mxu0 %v930_v0  ;;  %855 = vmatpush3.bf16.xpose.msra.mxu1 %v368_v57 }
 0x1f5   :  { %856 = vmatprep.subr.bf16.mxu1 %v930_v0 }
 0x1fb   :  { %837 = vmatpush3.bf16.xpose.msra.mxu0 %v371_v58 }
 0x1fc   :  { %838 = vmatprep.subr.bf16.mxu0 %v930_v0  ;;  %857 = vmatpush3.bf16.xpose.msra.mxu1 %v371_v58 }
 0x1fd   :  { %858 = vmatprep.subr.bf16.mxu1 %v930_v0 }
 0x203   :  { %839 = vmatpush3.bf16.xpose.msra.mxu0 %v374_v59 }
 0x204   :  { %859 = vmatpush3.bf16.xpose.msra.mxu1 %v374_v59 }
 0x29d   :  { %v293_v60 = vpop.f32.mrb[12].mxu0 }
 0x29e   :  { %v299_v61 = vmul.f32 0.03125, %v293_v60  ;;  %v802_v62 = vpop.f32.mrb[13].mxu0  ;;  %v335_v63 = vpop.f32.mrb[4].mxu1 }
 0x29f   :  { %v341_v1 = vmul.f32 0.03125, %v335_v63  ;;  %v296_v2 = vpop.f32.mrb[14].mxu0  ;;  %v822_v3 = vpop.f32.mrb[5].mxu1 }
 0x2a0   :  { %v342_v4 = vmul.f32 %v299_v61, %v299_v61  ;;  %v347_v5 = vpack.c.bf16 %v299_v61, %v299_v61  ;;  %v803_v6 = vpop.f32.mrb[15].mxu0  ;;  %v338_v8 = vpop.f32.mrb[6].mxu1 }
 0x2a1   :  { %v823_v9 = vpop.f32.mrb[7].mxu1 }
 0x2a2   :  { %v343_v10 = vsub.f32 %v341_v1, %v342_v4  ;;  %841 = vmatmul.mubr.msk.bf16.vlgmr.msra.gmra.mrb[16].mxu0 %vm348_vm5, %v347_v5 }
 0x2a3   :  { %535 = vmatprep.mubr.bf16.mxu0 %v932_v7 }
 0x2a4   :  { %v344_v0 = vmax.f32 %v343_v10, 0.0 }
 0x2a6   :  { %v345_v11 = vadd.f32 1e-05, %v344_v0 }
 0x2a8   :  { %884 = vrsqrt.f32 %v345_v11 }
 0x2b2   :  { %v885_v12 = vpop.eup %884 }
 0x2b3   :  { %v416_v13 = vpack.c.bf16 %v885_v12, %v885_v12 }
 0x2b5   :  { %861 = vmatmul.mubr.msk.bf16.vlgmr.msra.gmra.mrb[8].mxu1 %vm348_vm5, %v416_v13 }
 0x2b6   :  { %555 = vmatprep.mubr.bf16.mxu1 %v932_v7 }
 0x375   :  { %v410_v14 = vpop.f32.mrb[16].mxu0 }
 0x376   :  { %v842_v15 = vpop.f32.mrb[17].mxu0  ;;  %v468_v24 = vpack.c.bf16 %v410_v14, %v410_v14 }
 0x377   :  { %v413_v16 = vpop.f32.mrb[18].mxu0 }
 0x378   :  { %v843_v18 = vpop.f32.mrb[19].mxu0  ;;  %v498_v32 = vsel %vm496_vm6, %v468_v24, 0 }
 0x388   :  { %v454_v22 = vpop.f32.mrb[8].mxu1 }
 0x389   :  { %v467_v25 = vmul.f32 %v698_v21, %v454_v22  ;;  %v862_v26 = vpop.f32.mrb[9].mxu1 }
 0x38a   :  { %v457_v28 = vpop.f32.mrb[10].mxu1 }
 0x38b   :  { %v469_v29 = vpack.c.bf16 %v467_v25, %v467_v25  ;;  %v863_v31 = vpop.f32.mrb[11].mxu1 }
 0x38d   :  { %699 = vmatprep.subr.msk.bf16.mxu0 %vm496_vm6, %v469_v29  ;;  %864 = vmatprep.subr.msk.bf16.mxu1 %vm496_vm6, %v469_v29 }
 0x38e   :  { %504 = vmatpush1.bf16.msra.mxu0 %v498_v32  ;;  %865 = vmatpush1.bf16.msra.mxu1 %v498_v32 }
 0x391   :  { %700 = vmatmul.mubr.msk.bf16.vlgmr.msra.gmra.mrb[20].mxu0 %vm486_vm7, %v478_v19  ;;  %702 = vmatmul.mubr.msk.bf16.vlgmr.msra.gmra.mrb[12].mxu1 %vm486_vm7, %v480_v33 }
 0x392   :  { %545 = vmatprep.mubr.bf16.mxu0 %v932_v7 }
 0x399   :  { %701 = vmatmul.mubr.msk.bf16.gmra.mrb[24].mxu0 %vm486_vm7, %v479_v23 }
 0x464   :  { %v537_v34 = vpop.f32.mrb[20].mxu0  ;;  %v557_v35 = vpop.f32.mrb[12].mxu1 }
 0x465   :  { %v564_v36 = vsub.f32 %v1057_v17, %v537_v34  ;;  %v568_v38 = vsub.f32 %v1077_v37, %v557_v35  ;;  %v539_v39 = vpop.f32.mrb[21].mxu0  ;;  %v559_v40 = vpop.f32.mrb[13].mxu1 }
 0x466   :  { %v541_v42 = vpop.f32.mrb[22].mxu0  ;;  %v561_v43 = vpop.f32.mrb[14].mxu1 }
 0x467   :  { %v569_v44 = vmul.f32 %v564_v36, %v539_v39  ;;  %v565_v45 = vsub.f32 %v1059_v20, %v541_v42  ;;  %v573_v46 = vmul.f32 %v568_v38, %v559_v40  ;;  %v543_v7 = vpop.f32.mrb[23].mxu0  ;;  %v562_v47 = vpop.f32.mrb[15].mxu1 }
 0x469   :  { %v581_v48 = vadd.f32 %v703_v41, %v569_v44  ;;  %v585_v49 = vadd.f32 %v703_v41, %v573_v46  ;;  %v570_v50 = vmul.f32 %v565_v45, %v543_v7 }
 0x46b   :  { %v586_v17 = vmin.f32 %v581_v48, 20.0  ;;  %v590_v51 = vmin.f32 %v585_v49, 20.0  ;;  %v582_v37 = vadd.f32 %v703_v41, %v570_v50 }
 0x46c   :  { %v547_v52 = vpop.f32.mrb[24].mxu0 }
 0x46d   :  { %v591_v53 = vmul.f32 1.442695, %v586_v17  ;;  %v599_v54 = vmul.f32 1.442695, %v590_v51  ;;  %v587_v55 = vmin.f32 %v582_v37, 20.0  ;;  %v566_v56 = vsub.f32 %v1067_v27, %v547_v52  ;;  %v549_v57 = vpop.f32.mrb[25].mxu0 }
 0x46e   :  { %v551_v58 = vpop.f32.mrb[26].mxu0 }
 0x46f   :  { %886 = vpow2.f32 %v591_v53  ;;  %v593_v59 = vmul.f32 1.442695, %v587_v55  ;;  %v571_v20 = vmul.f32 %v566_v56, %v549_v57  ;;  %v567_v60 = vsub.f32 %v1069_v30, %v551_v58  ;;  %v553_v61 = vpop.f32.mrb[27].mxu0 }
 0x470   :  { %888 = vpow2.f32 %v599_v54 }
 0x471   :  { %890 = vpow2.f32 %v593_v59  ;;  %v583_v62 = vadd.f32 %v703_v41, %v571_v20  ;;  %v572_v63 = vmul.f32 %v567_v60, %v553_v61 }
 0x473   :  { %v588_v1 = vmin.f32 %v583_v62, 20.0  ;;  %v584_v2 = vadd.f32 %v703_v41, %v572_v63 }
 0x475   :  { %v595_v3 = vmul.f32 1.442695, %v588_v1  ;;  %v589_v4 = vmin.f32 %v584_v2, 20.0 }
 0x477   :  { %892 = vpow2.f32 %v595_v3  ;;  %v597_v5 = vmul.f32 1.442695, %v589_v4 }
 0x479   :  { %v887_v6 = vpop.eup %886  ;;  %894 = vpow2.f32 %v597_v5 }
 0x47a   :  { %v889_v27 = vpop.eup %888  ;;  %v601_v8 = vadd.f32 1.0, %v887_v6 }
 0x47b   :  { %v891_v9 = vpop.eup %890  ;;  %v605_v10 = vadd.f32 1.0, %v889_v27 }
 0x47c   :  { %v606_v0 = vmul.f32 %v601_v8, %v601_v8  ;;  %v602_v11 = vadd.f32 1.0, %v891_v9 }
 0x47d   :  { %v610_v30 = vmul.f32 %v605_v10, %v605_v10 }
 0x47e   :  { %v621_v12 = vadd.f32 1.0, %v606_v0  ;;  %v607_v13 = vmul.f32 %v602_v11, %v602_v11  ;;  %v704_v26 = vadd.f32 -1.0, %v606_v0 }
 0x47f   :  { %v625_v14 = vadd.f32 1.0, %v610_v30  ;;  %v708_v23 = vadd.f32 -1.0, %v610_v30 }
 0x480   :  { %896 = vrcp.f32 %v621_v12  ;;  %v622_v15 = vadd.f32 1.0, %v607_v13  ;;  %v705_v28 = vadd.f32 -1.0, %v607_v13  ;;  %v616_v34 = vmul.f32 %v704_v26, %v581_v48 }
 0x481   :  { %v893_v16 = vpop.eup %892  ;;  %898 = vrcp.f32 %v625_v14  ;;  %v620_v32 = vmul.f32 %v708_v23, %v585_v49 }
 0x482   :  { %900 = vrcp.f32 %v622_v15  ;;  %v603_v18 = vadd.f32 1.0, %v893_v16  ;;  %v617_v35 = vmul.f32 %v705_v28, %v582_v37 }
 0x483   :  { %v895_v19 = vpop.eup %894 }
 0x484   :  { %v608_v21 = vmul.f32 %v603_v18, %v603_v18  ;;  %v604_v22 = vadd.f32 1.0, %v895_v19 }
 0x486   :  { %v623_v24 = vadd.f32 1.0, %v608_v21  ;;  %v609_v25 = vmul.f32 %v604_v22, %v604_v22  ;;  %v706_v43 = vadd.f32 -1.0, %v608_v21 }
 0x488   :  { %902 = vrcp.f32 %v623_v24  ;;  %v624_v29 = vadd.f32 1.0, %v609_v25  ;;  %v707_v44 = vadd.f32 -1.0, %v609_v25  ;;  %v618_v46 = vmul.f32 %v706_v43, %v583_v62 }
 0x48a   :  { %v897_v31 = vpop.eup %896  ;;  %904 = vrcp.f32 %v624_v29  ;;  %v619_v7 = vmul.f32 %v707_v44, %v584_v2 }
 0x48b   :  { %v899_v33 = vpop.eup %898  ;;  %v631_v39 = vmul.f32 %v897_v31, %v616_v34 }
 0x48c   :  { %v901_v36 = vpop.eup %900  ;;  %v635_v38 = vmul.f32 %v899_v33, %v620_v32 }
 0x48d   :  { %v632_v40 = vmul.f32 %v901_v36, %v617_v35 }
 0x48e   :  { %v718_v41 = vpack.c.bf16 %v635_v38, %v635_v38 }
 0x48f   :  { %v722_v42 = vpack.c.bf16 %v632_v40, %v631_v39 }
 0x490   :  { %661 = vst [vmem:[#allocation2 + $0x10] sm:$0x3] %v718_v41 }
 0x491   :  { %723 = vst [vmem:[#allocation2] sm:$0xff] %v722_v42  }
 0x492   :  { %v903_v45 = vpop.eup %902 }
 0x493   :  { %v633_v49 = vmul.f32 %v903_v45, %v618_v46 }
 0x494   :  { %v905_v47 = vpop.eup %904 }
 0x495   :  { %v634_v50 = vmul.f32 %v905_v47, %v619_v7 }
 0x497   :  { %v727_v48 = vpack.c.bf16 %v634_v50, %v633_v49 }
 0x499   :  { %729 = vst [vmem:[#allocation2 + $0x8] sm:$0xff] %v727_v48  }
 0x49a   :  { %917 = shalt.err (!%p914_p4)
}
 0x49b   :  { %s918_s30 = scalar_lea.hbm %s1174_s7, 320 }
 0x49c   :  { %p919_p5 = scmp.ne.s32.totalorder %s1174_s7, %s918_s30  ;;  %p922_p6 = scmp.lt.u32.totalorder %s918_s30, %s1174_s7 }
 0x49e   :  { %p924_p7 = pnand %p922_p6, %p919_p5 }
 0x4a0   :  { %927 = shalt.err (!%p924_p7)
}
 0x4a1   :  { %s934_s0 = smov 64   ;;  %s935_s12 = smov 4  }
 0x4a2   :  { %673 = dma.vmem_to_hbm [thread:$0]  %s668_s27, 320, %s1174_s7, [#allocation3], %s934_s0, %s934_s0, %s935_s12  }
 0x4a3   :  { %928 = dma.done.wait [#allocation3], 320  }
 0x4a4   :  { %929 = vsyncadd [#allocation3], 4294966976 }
 0x4a5   :  { %677 = vsyncpa [#allocation3], 1 }

</bundles_post_ra>
